<compile_context>
chip_gen: v6e
topology: v6e:2x2x1
jax: 0.10.0
libtpu: 0.0.40
codegen_flags: <defaults>
</compile_context>

<pallas_src>
import functools
import math

import jax
import jax.numpy as jnp
from jax.experimental import pallas as pl
from jax.experimental.pallas import tpu as pltpu

_EPS = 1e-12
_LANE = 128
_SUBLANE = 8


# ----------------------------------------------------------------------------
# Hardware / tiling helpers
# ----------------------------------------------------------------------------
@functools.lru_cache(maxsize=1)
def _vmem_budget_limit():
    """(residency budget, scoped vmem limit) in bytes, generation aware."""
    cap = None
    try:
        cap = pltpu.get_tpu_info().vmem_capacity_bytes
    except Exception:  # defensive: older jax / unusual backends
        cap = None
    if cap is not None and cap >= 100 * 1024 * 1024:
        # v5e / v6e: 128 MiB physical VMEM -> bigger tiles, fewer grid steps.
        return 48 * 1024 * 1024, 64 * 1024 * 1024
    # v7x (64 MiB physical VMEM) or unknown: conservative residency.
    return 24 * 1024 * 1024, 32 * 1024 * 1024


def _cparams(dim_sem, vmem_limit):
    return pltpu.CompilerParams(dimension_semantics=dim_sem,
                                vmem_limit_bytes=vmem_limit)


def _sublane_mult(*dtypes):
    """Sublane alignment: 8 rows for 4-byte, 16 for 2-byte, 32 for 1-byte."""
    m = _SUBLANE
    for dt in dtypes:
        isz = jnp.dtype(dt).itemsize
        m = max(m, _SUBLANE * max(1, 4 // max(isz, 1)))
    return m


def _max_block_elems(budget, bytes_per_elem, override):
    """Max elements per block given the per-element VMEM residency cost."""
    if override is not None:
        return max(int(override), _SUBLANE * _LANE)
    return max(budget // max(bytes_per_elem, 1), _SUBLANE * _LANE)


def _align_down(x, a):
    return (x // a) * a


def _divisors(n):
    out = []
    i = 1
    while i * i <= n:
        if n % i == 0:
            out.append(i)
            out.append(n // i)
        i += 1
    return out


def _pick_dim_tile(dim, align, cap):
    """Largest tile <= cap for `dim`: the full dim if it fits, else the largest
    `align`-multiple divisor of dim (no ragged tail), else an align multiple."""
    if dim <= cap:
        return dim
    best = 0
    for d in _divisors(dim):
        if d <= cap and d % align == 0 and d > best:
            best = d
    if best >= align:
        return best
    return min(dim, max(align, _align_down(cap, align)))


def _choose_flat(total):
    """Lane-dense (rows, lanes) view of `total` elements, or None if total%128."""
    for lanes in (2048, 1024, 512, 256, 128):
        if total % lanes == 0:
            return total // lanes, lanes
    return None


# ----------------------------------------------------------------------------
# Kernels: reduction 'none'
# ----------------------------------------------------------------------------
def _none_kernel(p_ref, t_ref, o_ref, *, loss_weight):
    diff = p_ref[...].astype(jnp.float32) - t_ref[...].astype(jnp.float32)
    out = diff * diff
    if loss_weight != 1.0:
        out = out * jnp.float32(loss_weight)
    o_ref[...] = out.astype(o_ref.dtype)


def _none_kernel_w(p_ref, t_ref, w_ref, o_ref, *, loss_weight):
    diff = p_ref[...].astype(jnp.float32) - t_ref[...].astype(jnp.float32)
    out = diff * diff * w_ref[...].astype(jnp.float32)
    if loss_weight != 1.0:
        out = out * jnp.float32(loss_weight)
    o_ref[...] = out.astype(o_ref.dtype)


def _none_bcast_kernel(p_ref, t_ref, w_ref, o_ref, *, loss_weight):
    # p/t/o blocks are (1, C, tile_s); w block is (1, 1, tile_s) and is
    # broadcast over the channel (sublane) axis in VMEM -- never in HBM.
    diff = p_ref[...].astype(jnp.float32) - t_ref[...].astype(jnp.float32)
    out = diff * diff * w_ref[...].astype(jnp.float32)
    if loss_weight != 1.0:
        out = out * jnp.float32(loss_weight)
    o_ref[...] = out.astype(o_ref.dtype)


# ----------------------------------------------------------------------------
# Kernels: global sums (2-chunk megacore split over rows)
# ----------------------------------------------------------------------------
# NOTE on ragged tails: out-of-bounds rows of a tail/overflow block contain
# unspecified data.  It is only ever discarded by jnp.where at the same element
# position (never mixed across the masked axis beforehand), so NaN/Inf garbage
# cannot leak into the accumulated result.
def _gsum_kernel(p_ref, t_ref, part_ref, acc_ref, *,
                 tiles_per_chunk, tile_r, total_rows, mask_from):
    c = pl.program_id(0)
    i = pl.program_id(1)

    @pl.when(i == 0)
    def _():
        acc_ref[...] = jnp.zeros_like(acc_ref)

    diff = p_ref[...].astype(jnp.float32) - t_ref[...].astype(jnp.float32)
    sq = diff * diff
    gbi = c * tiles_per_chunk + i  # global row-tile index (unclamped)

    if mask_from is None:
        acc_ref[...] += sq
    else:
        @pl.when(gbi < mask_from)
        def _():
            acc_ref[...] += sq

        @pl.when(gbi >= mask_from)
        def _():
            row_idx = gbi * tile_r + jax.lax.broadcasted_iota(
                jnp.int32, sq.shape, 0)
            acc_ref[...] += jnp.where(row_idx < total_rows, sq, 0.0)

    @pl.when(i == tiles_per_chunk - 1)
    def _():
        part_ref[...] = jnp.full(part_ref.shape, jnp.sum(acc_ref[...]),
                                 dtype=part_ref.dtype)


def _gsum_kernel_w(p_ref, t_ref, w_ref, lpart_ref, wpart_ref, acc_ref,
                   wacc_ref, *, tiles_per_chunk, tile_r, total_rows, mask_from):
    c = pl.program_id(0)
    i = pl.program_id(1)

    @pl.when(i == 0)
    def _():
        acc_ref[...] = jnp.zeros_like(acc_ref)
        wacc_ref[...] = jnp.zeros_like(wacc_ref)

    diff = p_ref[...].astype(jnp.float32) - t_ref[...].astype(jnp.float32)
    w = w_ref[...].astype(jnp.float32)
    sq = diff * diff * w
    gbi = c * tiles_per_chunk + i

    if mask_from is None:
        acc_ref[...] += sq
        wacc_ref[...] += w
    else:
        @pl.when(gbi < mask_from)
        def _():
            acc_ref[...] += sq
            wacc_ref[...] += w

        @pl.when(gbi >= mask_from)
        def _():
            row_idx = gbi * tile_r + jax.lax.broadcasted_iota(
                jnp.int32, sq.shape, 0)
            m = row_idx < total_rows
            acc_ref[...] += jnp.where(m, sq, 0.0)
            wacc_ref[...] += jnp.where(m, w, 0.0)

    @pl.when(i == tiles_per_chunk - 1)
    def _():
        lpart_ref[...] = jnp.full(lpart_ref.shape, jnp.sum(acc_ref[...]),
                                  dtype=lpart_ref.dtype)
        wpart_ref[...] = jnp.full(wpart_ref.shape, jnp.sum(wacc_ref[...]),
                                  dtype=wpart_ref.dtype)


# ----------------------------------------------------------------------------
# Kernels: per-sample sums (sample_wise mean and non-128-divisible fallback)
# ----------------------------------------------------------------------------
def _psum_kernel(p_ref, t_ref, loss_ref, acc_ref, *, tile_d, d_total, mask_from):
    k = pl.program_id(1)

    @pl.when(k == 0)
    def _():
        acc_ref[...] = jnp.zeros_like(acc_ref)

    diff = p_ref[...].astype(jnp.float32) - t_ref[...].astype(jnp.float32)
    sq = diff * diff

    if mask_from is None:
        acc_ref[...] += sq
    else:
        @pl.when(k < mask_from)
        def _():
            acc_ref[...] += sq

        @pl.when(k >= mask_from)
        def _():
            col_idx = k * tile_d + jax.lax.broadcasted_iota(
                jnp.int32, sq.shape, 1)
            acc_ref[...] += jnp.where(col_idx < d_total, sq, 0.0)

    @pl.when(k == pl.num_programs(1) - 1)
    def _():
        loss_ref[...] = jnp.sum(acc_ref[...], axis=-1, keepdims=True)


def _psum_kernel_w(p_ref, t_ref, w_ref, loss_ref, wsum_ref, acc_ref, wacc_ref,
                   *, tile_d, d_total, mask_from):
    k = pl.program_id(1)

    @pl.when(k == 0)
    def _():
        acc_ref[...] = jnp.zeros_like(acc_ref)
        wacc_ref[...] = jnp.zeros_like(wacc_ref)

    diff = p_ref[...].astype(jnp.float32) - t_ref[...].astype(jnp.float32)
    w = w_ref[...].astype(jnp.float32)
    sq = diff * diff * w

    if mask_from is None:
        acc_ref[...] += sq
        wacc_ref[...] += w
    else:
        @pl.when(k < mask_from)
        def _():
            acc_ref[...] += sq
            wacc_ref[...] += w

        @pl.when(k >= mask_from)
        def _():
            col_idx = k * tile_d + jax.lax.broadcasted_iota(
                jnp.int32, sq.shape, 1)
            m = col_idx < d_total
            acc_ref[...] += jnp.where(m, sq, 0.0)
            wacc_ref[...] += jnp.where(m, w, 0.0)

    @pl.when(k == pl.num_programs(1) - 1)
    def _():
        loss_ref[...] = jnp.sum(acc_ref[...], axis=-1, keepdims=True)
        wsum_ref[...] = jnp.sum(wacc_ref[...], axis=-1, keepdims=True)


# ----------------------------------------------------------------------------
# Kernel: broadcast-channel weight, per-sample sums (serves 'sum'/'mean')
# ----------------------------------------------------------------------------
def _bsum_kernel(p_ref, t_ref, w_ref, loss_ref, wsum_ref, acc_ref, wacc_ref, *,
                 tile_s, s_total, mask_from):
    # p/t blocks: (N, C, tile_s); w block: (N, 1, tile_s); acc: (N, 1, tile_s).
    # Single 'arbitrary' reduction axis (no megacore split here): the HBM
    # saving from not materializing the broadcast dominates on this path.
    k = pl.program_id(0)

    @pl.when(k == 0)
    def _():
        acc_ref[...] = jnp.zeros_like(acc_ref)
        wacc_ref[...] = jnp.zeros_like(wacc_ref)

    diff = p_ref[...].astype(jnp.float32) - t_ref[...].astype(jnp.float32)
    sq = diff * diff
    csum = jnp.sum(sq, axis=1, keepdims=True)        # reduce over C (sublanes)
    w = w_ref[...].astype(jnp.float32)
    wsq = csum * w

    if mask_from is None:
        acc_ref[...] += wsq
        wacc_ref[...] += w
    else:
        @pl.when(k < mask_from)
        def _():
            acc_ref[...] += wsq
            wacc_ref[...] += w

        @pl.when(k >= mask_from)
        def _():
            col_idx = k * tile_s + jax.lax.broadcasted_iota(
                jnp.int32, w.shape, 2)
            m = col_idx < s_total
            acc_ref[...] += jnp.where(m, wsq, 0.0)
            wacc_ref[...] += jnp.where(m, w, 0.0)

    @pl.when(k == pl.num_programs(0) - 1)
    def _():
        loss_ref[...] = jnp.sum(acc_ref[...], axis=-1)   # (N, 1)
        wsum_ref[...] = jnp.sum(wacc_ref[...], axis=-1)  # (N, 1), excludes * C


# ----------------------------------------------------------------------------
# pallas_call launchers
# ----------------------------------------------------------------------------
def _launch_none(p2, t2, w2, out_dtype, loss_weight, block_elems, budget, limit):
    rows, cols = p2.shape
    dts = [p2.dtype, t2.dtype, jnp.dtype(out_dtype)]
    if w2 is not None:
        dts.append(w2.dtype)
    bpe = 2 * sum(jnp.dtype(dt).itemsize for dt in dts)  # all double-buffered
    max_elems = _max_block_elems(budget, bpe, block_elems)
    sub = _sublane_mult(*dts)
    tile_c = _pick_dim_tile(cols, _LANE, max(max_elems, _LANE))
    tile_r = _pick_dim_tile(rows, sub, max(1, max_elems // tile_c))
    grid = (pl.cdiv(rows, tile_r), pl.cdiv(cols, tile_c))
    spec = pl.BlockSpec((tile_r, tile_c), lambda i, j: (i, j))
    arrays = [p2, t2] if w2 is None else [p2, t2, w2]
    kernel_fn = _none_kernel if w2 is None else _none_kernel_w
    kernel = functools.partial(kernel_fn, loss_weight=loss_weight)
    return pl.pallas_call(
        kernel,
        out_shape=jax.ShapeDtypeStruct((rows, cols), out_dtype),
        grid_spec=pltpu.PrefetchScalarGridSpec(
            num_scalar_prefetch=0, grid=grid,
            in_specs=[spec] * len(arrays), out_specs=spec),
        compiler_params=_cparams(("parallel", "parallel"), limit),
    )(*arrays)


def _launch_none_bcast(p3, t3, w3, out_dtype, loss_weight, block_elems,
                       budget, limit):
    n, c, s = p3.shape
    unit_bytes = (c * 2 * (p3.dtype.itemsize + t3.dtype.itemsize
                           + jnp.dtype(out_dtype).itemsize)
                  + 2 * w3.dtype.itemsize)
    if block_elems is not None:
        cap_s = max(int(block_elems) // max(c, 1), _LANE)
    else:
        cap_s = max(budget // max(unit_bytes, 1), _LANE)
    tile_s = _pick_dim_tile(s, _LANE, cap_s)
    grid = (n, pl.cdiv(s, tile_s))
    pt_spec = pl.BlockSpec((1, c, tile_s), lambda i, k: (i, 0, k))
    w_spec = pl.BlockSpec((1, 1, tile_s), lambda i, k: (i, 0, k))
    kernel = functools.partial(_none_bcast_kernel, loss_weight=loss_weight)
    return pl.pallas_call(
        kernel,
        out_shape=jax.ShapeDtypeStruct((n, c, s), out_dtype),
        grid_spec=pltpu.PrefetchScalarGridSpec(
            num_scalar_prefetch=0, grid=grid,
            in_specs=[pt_spec, pt_spec, w_spec], out_specs=pt_spec),
        compiler_params=_cparams(("parallel", "parallel"), limit),
    )(p3, t3, w3)


def _launch_global_sums(p2, t2, w2, block_elems, budget, limit):
    rows, cols = p2.shape  # cols is a multiple of 128 (lane-dense flat view)
    weighted = w2 is not None
    in_itemsize = (p2.dtype.itemsize + t2.dtype.itemsize
                   + (w2.dtype.itemsize if weighted else 0))
    n_scratch = 2 if weighted else 1
    bpe = 2 * in_itemsize + 4 * n_scratch
    max_elems = _max_block_elems(budget, bpe, block_elems)
    sub = _sublane_mult(p2.dtype, t2.dtype, *((w2.dtype,) if weighted else ()))
    cap_r = max(1, max_elems // cols)
    tile_r = _pick_dim_tile(rows, sub, cap_r)
    row_tiles = pl.cdiv(rows, tile_r)

    # Megacore: leading 'parallel' chunk axis (2 chunks feed both v7x cores).
    num_chunks = 2 if row_tiles >= 2 else 1
    tpc = pl.cdiv(row_tiles, num_chunks)
    ragged = (rows % tile_r) != 0
    overflow = num_chunks * tpc > row_tiles
    if ragged:
        mask_from = row_tiles - 1
    elif overflow:
        mask_from = row_tiles
    else:
        mask_from = None

    if overflow:
        last_blk = row_tiles - 1
        in_idx = lambda c, i: (jnp.minimum(c * tpc + i, last_blk), 0)
    else:
        in_idx = lambda c, i: (c * tpc + i, 0)

    in_spec = pl.BlockSpec((tile_r, cols), in_idx)
    part_shape = jax.ShapeDtypeStruct((num_chunks, _SUBLANE, _LANE), jnp.float32)
    part_spec = pl.BlockSpec((1, _SUBLANE, _LANE), lambda c, i: (c, 0, 0))
    cparams = _cparams(("parallel", "arbitrary"), limit)
    grid = (num_chunks, tpc)

    if not weighted:
        kernel = functools.partial(_gsum_kernel, tiles_per_chunk=tpc,
                                   tile_r=tile_r, total_rows=rows,
                                   mask_from=mask_from)
        parts = pl.pallas_call(
            kernel,
            out_shape=part_shape,
            grid_spec=pltpu.PrefetchScalarGridSpec(
                num_scalar_prefetch=0, grid=grid,
                in_specs=[in_spec, in_spec], out_specs=part_spec,
                scratch_shapes=[pltpu.VMEM((tile_r, cols), jnp.float32)]),
            compiler_params=cparams,
        )(p2, t2)
        return jnp.sum(parts[:, 0, 0]), None

    kernel = functools.partial(_gsum_kernel_w, tiles_per_chunk=tpc,
                               tile_r=tile_r, total_rows=rows,
                               mask_from=mask_from)
    lparts, wparts = pl.pallas_call(
        kernel,
        out_shape=(part_shape, part_shape),
        grid_spec=pltpu.PrefetchScalarGridSpec(
            num_scalar_prefetch=0, grid=grid,
            in_specs=[in_spec, in_spec, in_spec],
            out_specs=(part_spec, part_spec),
            scratch_shapes=[pltpu.VMEM((tile_r, cols), jnp.float32),
                            pltpu.VMEM((tile_r, cols), jnp.float32)]),
        compiler_params=cparams,
    )(p2, t2, w2)
    return jnp.sum(lparts[:, 0, 0]), jnp.sum(wparts[:, 0, 0])


def _launch_per_sample_sums(p2, t2, w2, block_elems, budget, limit):
    n, d = p2.shape
    weighted = w2 is not None
    in_itemsize = (p2.dtype.itemsize + t2.dtype.itemsize
                   + (w2.dtype.itemsize if weighted else 0))
    n_scratch = 2 if weighted else 1
    bpe = 2 * in_itemsize + 4 * n_scratch
    max_elems = _max_block_elems(budget, bpe, block_elems)
    sub = _sublane_mult(p2.dtype, t2.dtype, *((w2.dtype,) if weighted else ()))
    tile_d = _pick_dim_tile(d, _LANE, max(max_elems, _LANE))
    tile_n = _pick_dim_tile(n, sub, max(1, max_elems // tile_d))
    d_tiles = pl.cdiv(d, tile_d)
    mask_from = (d_tiles - 1) if (d % tile_d) != 0 else None
    grid = (pl.cdiv(n, tile_n), d_tiles)

    in_spec = pl.BlockSpec((tile_n, tile_d), lambda i, k: (i, k))
    acc_spec = pl.BlockSpec((tile_n, 1), lambda i, k: (i, 0))
    acc_shape = jax.ShapeDtypeStruct((n, 1), jnp.float32)
    cparams = _cparams(("parallel", "arbitrary"), limit)

    if not weighted:
        kernel = functools.partial(_psum_kernel, tile_d=tile_d, d_total=d,
                                   mask_from=mask_from)
        loss_sum = pl.pallas_call(
            kernel,
            out_shape=acc_shape,
            grid_spec=pltpu.PrefetchScalarGridSpec(
                num_scalar_prefetch=0, grid=grid,
                in_specs=[in_spec, in_spec], out_specs=acc_spec,
                scratch_shapes=[pltpu.VMEM((tile_n, tile_d), jnp.float32)]),
            compiler_params=cparams,
        )(p2, t2)
        return loss_sum, None

    kernel = functools.partial(_psum_kernel_w, tile_d=tile_d, d_total=d,
                               mask_from=mask_from)
    loss_sum, w_sum = pl.pallas_call(
        kernel,
        out_shape=(acc_shape, acc_shape),
        grid_spec=pltpu.PrefetchScalarGridSpec(
            num_scalar_prefetch=0, grid=grid,
            in_specs=[in_spec, in_spec, in_spec],
            out_specs=(acc_spec, acc_spec),
            scratch_shapes=[pltpu.VMEM((tile_n, tile_d), jnp.float32),
                            pltpu.VMEM((tile_n, tile_d), jnp.float32)]),
        compiler_params=cparams,
    )(p2, t2, w2)
    return loss_sum, w_sum


def _launch_bcast_sums(p3, t3, w3, block_elems, budget, limit):
    n, c, s = p3.shape
    unit_bytes = (n * c * 2 * (p3.dtype.itemsize + t3.dtype.itemsize)
                  + n * (2 * w3.dtype.itemsize + 2 * 4))
    if block_elems is not None:
        cap_s = max(int(block_elems) // max(n * c, 1), _LANE)
    else:
        cap_s = max(budget // max(unit_bytes, 1), _LANE)
    tile_s = _pick_dim_tile(s, _LANE, cap_s)
    s_tiles = pl.cdiv(s, tile_s)
    mask_from = (s_tiles - 1) if (s % tile_s) != 0 else None

    pt_spec = pl.BlockSpec((n, c, tile_s), lambda k: (0, 0, k))
    w_spec = pl.BlockSpec((n, 1, tile_s), lambda k: (0, 0, k))
    out_spec = pl.BlockSpec((n, 1), lambda k: (0, 0))
    out_shape = jax.ShapeDtypeStruct((n, 1), jnp.float32)

    kernel = functools.partial(_bsum_kernel, tile_s=tile_s, s_total=s,
                               mask_from=mask_from)
    loss_s, wsum_s = pl.pallas_call(
        kernel,
        out_shape=(out_shape, out_shape),
        grid_spec=pltpu.PrefetchScalarGridSpec(
            num_scalar_prefetch=0, grid=(s_tiles,),
            in_specs=[pt_spec, pt_spec, w_spec],
            out_specs=(out_spec, out_spec),
            scratch_shapes=[pltpu.VMEM((n, 1, tile_s), jnp.float32),
                            pltpu.VMEM((n, 1, tile_s), jnp.float32)]),
        compiler_params=_cparams(("arbitrary",), limit),
    )(p3, t3, w3)
    return loss_s, wsum_s  # wsum_s excludes the * C broadcast factor


def _bcast_fits(n, c, s, pred, target, weight, budget):
    """Can the broadcast-weight reduction kernel hold one minimal block?"""
    itm = pred.dtype.itemsize + target.dtype.itemsize
    unit = n * c * 2 * itm + n * (2 * weight.dtype.itemsize + 2 * 4)
    return unit * min(s, _LANE) <= budget


# ----------------------------------------------------------------------------
# Public wrapper (mmedit MSELoss.forward equivalent)
# ----------------------------------------------------------------------------
@functools.partial(jax.jit, static_argnames=("loss_weight", "reduction",
                                             "sample_wise", "block_elems"))
def mse_loss_pallas(pred, target, weight=None, *, loss_weight=1.0,
                    reduction="mean", sample_wise=False, block_elems=None):
    if reduction not in ("none", "mean", "sum"):
        raise ValueError(f"Unsupported reduction mode: {reduction}")
    assert pred.shape == target.shape
    orig_shape = pred.shape
    n = orig_shape[0]
    total = math.prod(orig_shape)
    d = total // n
    budget, limit = _vmem_budget_limit()

    has_weight = weight is not None
    c_dim = orig_shape[1] if pred.ndim >= 2 else 1
    s_dim = math.prod(orig_shape[2:]) if pred.ndim >= 3 else 1

    bcast_c = False
    if has_weight and weight.shape != orig_shape:
        if (pred.ndim >= 3 and weight.ndim == pred.ndim
                and weight.shape[0] == n and weight.shape[1] == 1
                and weight.shape[2:] == orig_shape[2:]):
            # (N, 1, H, W) channel-broadcast weight: handled without
            # materializing the broadcast in HBM.
            bcast_c = True
        else:
            # Uncommon broadcast pattern: materialize (extra HBM traffic).
            weight = jnp.broadcast_to(weight, orig_shape)

    if bcast_c and not _bcast_fits(n, c_dim, s_dim, pred, target, weight, budget):
        weight = jnp.broadcast_to(weight, orig_shape)  # pathological N*C
        bcast_c = False

    flat = _choose_flat(total)

    if reduction == "none":
        if bcast_c:
            p3 = pred.reshape(n, c_dim, s_dim)
            t3 = target.reshape(n, c_dim, s_dim)
            w3 = weight.reshape(n, 1, s_dim)
            out = _launch_none_bcast(p3, t3, w3, pred.dtype, float(loss_weight),
                                     block_elems, budget, limit)
            return out.reshape(orig_shape)
        rows, lanes = flat if flat is not None else (n, d)
        p2 = pred.reshape(rows, lanes)
        t2 = target.reshape(rows, lanes)
        w2 = weight.reshape(rows, lanes) if has_weight else None
        out = _launch_none(p2, t2, w2, pred.dtype, float(loss_weight),
                           block_elems, budget, limit)
        return out.reshape(orig_shape)

    # 'mean' / 'sum' -> scalar result, accumulated in f32.
    if bcast_c:
        p3 = pred.reshape(n, c_dim, s_dim)
        t3 = target.reshape(n, c_dim, s_dim)
        w3 = weight.reshape(n, 1, s_dim)
        loss_ps, wsum_ps = _launch_bcast_sums(p3, t3, w3, block_elems,
                                              budget, limit)
        wsum_ps = wsum_ps * jnp.float32(c_dim)  # expand counts C per channel
        if reduction == "sum":
            result = jnp.sum(loss_ps)
        elif sample_wise:
            result = jnp.sum(loss_ps / (wsum_ps + _EPS)) / jnp.float32(n)
        else:
            result = jnp.sum(loss_ps) / (jnp.sum(wsum_ps) + _EPS)
    elif has_weight and reduction == "mean" and sample_wise:
        p2 = pred.reshape(n, d)
        t2 = target.reshape(n, d)
        w2 = weight.reshape(n, d)
        loss_ps, wsum_ps = _launch_per_sample_sums(p2, t2, w2, block_elems,
                                                   budget, limit)
        result = jnp.sum(loss_ps / (wsum_ps + _EPS)) / jnp.float32(n)
    else:
        if flat is not None:
            rows, lanes = flat
            p2 = pred.reshape(rows, lanes)
            t2 = target.reshape(rows, lanes)
            w2 = weight.reshape(rows, lanes) if has_weight else None
            loss_sum, w_sum = _launch_global_sums(p2, t2, w2, block_elems,
                                                  budget, limit)
        else:
            # Fallback for totals not divisible by 128: per-sample sums, then
            # a tiny (N,)-sized reduction in JAX.
            p2 = pred.reshape(n, d)
            t2 = target.reshape(n, d)
            w2 = weight.reshape(n, d) if has_weight else None
            ls, ws = _launch_per_sample_sums(p2, t2, w2, block_elems,
                                             budget, limit)
            loss_sum = jnp.sum(ls)
            w_sum = jnp.sum(ws) if has_weight else None
        if reduction == "sum":
            result = loss_sum
        elif not has_weight:
            result = loss_sum / jnp.float32(total)
        else:
            result = loss_sum / (w_sum + _EPS)

    return (jnp.float32(loss_weight) * result).astype(pred.dtype)


if __name__ == "__main__":
    key = jax.random.PRNGKey(0)
    k1, k2, k3, k4 = jax.random.split(key, 4)

    # Main config: (N, C, H, W) = (2, 4, 16, 16)
    N, C, H, W = 2, 4, 16, 16
    pred = jax.random.normal(k1, (N, C, H, W), jnp.float32)
    target = jax.random.normal(k2, (N, C, H, W), jnp.float32)
    weight = jax.random.uniform(k3, (N, C, H, W), jnp.float32)
    wb = jax.random.uniform(k4, (N, 1, H, W), jnp.float32)  # channel-broadcast

    out_mean = mse_loss_pallas(pred, target)                        # default
    out_sum = mse_loss_pallas(pred, target, reduction="sum")
    out_none = mse_loss_pallas(pred, target, reduction="none")
    out_wnone = mse_loss_pallas(pred, target, weight, reduction="none")
    out_wmean = mse_loss_pallas(pred, target, weight)               # weighted mean
    out_swmean = mse_loss_pallas(pred, target, weight, sample_wise=True)
    out_bnone = mse_loss_pallas(pred, target, wb, reduction="none")
    out_bmean = mse_loss_pallas(pred, target, wb)
    out_bsw = mse_loss_pallas(pred, target, wb, sample_wise=True)
    jax.block_until_ready((out_mean, out_sum, out_none, out_wnone, out_wmean,
                           out_swmean, out_bnone, out_bmean, out_bsw))

    diff2 = (pred - target) ** 2
    assert jnp.allclose(out_mean, diff2.mean(), rtol=1e-5, atol=1e-5)
    assert jnp.allclose(out_sum, diff2.sum(), rtol=1e-4, atol=1e-4)
    assert jnp.allclose(out_none, diff2, rtol=1e-5, atol=1e-6)
    assert jnp.allclose(out_wnone, diff2 * weight, rtol=1e-5, atol=1e-6)
    assert jnp.allclose(out_wmean, (diff2 * weight).sum() / (weight.sum() + _EPS),
                        rtol=1e-4, atol=1e-5)
    ws = weight.sum(axis=(1, 2, 3), keepdims=True)
    ref_sw = ((diff2 * weight) / (ws + _EPS)).sum() / N
    assert jnp.allclose(out_swmean, ref_sw, rtol=1e-4, atol=1e-5)
    # Channel-broadcast weight (no HBM materialization inside the kernel path).
    wbx = jnp.broadcast_to(wb, diff2.shape)
    assert jnp.allclose(out_bnone, diff2 * wb, rtol=1e-5, atol=1e-6)
    assert jnp.allclose(out_bmean, (diff2 * wbx).sum() / (wbx.sum() + _EPS),
                        rtol=1e-4, atol=1e-5)
    wsb = wbx.sum(axis=(1, 2, 3), keepdims=True)
    ref_bsw = ((diff2 * wbx) / (wsb + _EPS)).sum() / N
    assert jnp.allclose(out_bsw, ref_bsw, rtol=1e-4, atol=1e-5)

    # Forced-small-block config exercises the 2-chunk global reduction with a
    # ragged (tail-masked) row tile and multi-step per-sample accumulation.
    N2, C2, H2, W2 = 2, 4, 48, 48
    p2 = jax.random.normal(k1, (N2, C2, H2, W2), jnp.float32)
    t2 = jax.random.normal(k2, (N2, C2, H2, W2), jnp.float32)
    w2v = jax.random.uniform(k3, (N2, C2, H2, W2), jnp.float32)
    d2 = (p2 - t2) ** 2
    m2 = mse_loss_pallas(p2, t2, block_elems=4096)
    n2 = mse_loss_pallas(p2, t2, reduction="none", block_elems=4096)
    s2 = mse_loss_pallas(p2, t2, w2v, sample_wise=True, block_elems=4096)
    jax.block_until_ready((m2, n2, s2))
    assert jnp.allclose(m2, d2.mean(), rtol=1e-4, atol=1e-5)
    assert jnp.allclose(n2, d2, rtol=1e-5, atol=1e-6)
    ws2 = w2v.sum(axis=(1, 2, 3), keepdims=True)
    ref2 = ((d2 * w2v) / (ws2 + _EPS)).sum() / N2
    assert jnp.allclose(s2, ref2, rtol=1e-4, atol=1e-5)

    # Broadcast weight with a ragged spatial tail (exercises the tail-gated
    # masking in the broadcast-sum kernel).
    N4, C4, H4, W4 = 2, 4, 30, 30
    p4 = jax.random.normal(k1, (N4, C4, H4, W4), jnp.float32)
    t4 = jax.random.normal(k2, (N4, C4, H4, W4), jnp.float32)
    wb4 = jax.random.uniform(k4, (N4, 1, H4, W4), jnp.float32)
    d4 = (p4 - t4) ** 2
    m4 = mse_loss_pallas(p4, t4, wb4, block_elems=4096)
    jax.block_until_ready(m4)
    wb4x = jnp.broadcast_to(wb4, d4.shape)
    assert jnp.allclose(m4, (d4 * wb4x).sum() / (wb4x.sum() + _EPS),
                        rtol=1e-4, atol=1e-5)

    # Odd, non-128-divisible spatial size exercises the (N, D) fallback path.
    N3, C3, H3, W3 = 2, 3, 5, 7
    p3 = jax.random.normal(k1, (N3, C3, H3, W3), jnp.float32)
    t3 = jax.random.normal(k2, (N3, C3, H3, W3), jnp.float32)
    d3 = (p3 - t3) ** 2
    m3 = mse_loss_pallas(p3, t3)
    n3 = mse_loss_pallas(p3, t3, reduction="none")
    jax.block_until_ready((m3, n3))
    assert jnp.allclose(m3, d3.mean(), rtol=1e-5, atol=1e-5)
    assert jnp.allclose(n3, d3, rtol=1e-5, atol=1e-6)

    # bf16 inputs: exercises dtype-aware tiling / f32 accumulation / bf16 cast.
    pb = pred.astype(jnp.bfloat16)
    tb = target.astype(jnp.bfloat16)
    db = (pb.astype(jnp.float32) - tb.astype(jnp.float32)) ** 2
    mb = mse_loss_pallas(pb, tb)
    nb = mse_loss_pallas(pb, tb, reduction="none")
    jax.block_until_ready((mb, nb))
    assert jnp.allclose(mb.astype(jnp.float32), db.mean(), rtol=1e-2, atol=1e-2)
    assert jnp.allclose(nb.astype(jnp.float32), db, rtol=1e-2, atol=1e-2)

    print("KERNEL_OK")
</pallas_src>

<mosaic_0001>
module attributes {stable_mosaic.version = 11 : i64} {
  func.func @_gsum_kernel(%arg0: i32, %arg1: i32, %arg2: memref<1x2048xf32, #tpu.memory_space<vmem>>, %arg3: memref<1x2048xf32, #tpu.memory_space<vmem>>, %arg4: memref<1x8x128xf32, #tpu.memory_space<vmem>>, %arg5: memref<1x2048xf32, #tpu.memory_space<vmem>>) attributes {dimension_semantics = [#tpu.dimension_semantics<parallel>, #tpu.dimension_semantics<arbitrary>], iteration_bounds = array<i64: 1, 1>, scalar_prefetch = 0 : i64, scratch_operands = 1 : i64, tpu.core_type = #tpu.core_type<tc>, window_params = [{transform_indices = @transform_0, window_bounds = array<i64: 1, 2048>}, {transform_indices = @transform_1, window_bounds = array<i64: 1, 2048>}, {transform_indices = @transform_2, window_bounds = array<i64: 1, 8, 128>}]} {
    %c0_i32 = arith.constant 0 : i32
    %0 = arith.cmpi eq, %arg1, %c0_i32 : i32
    %1 = arith.extui %0 : i1 to i32
    %c0_i32_0 = arith.constant 0 : i32
    %2 = arith.cmpi ne, %1, %c0_i32_0 : i32
    scf.if %2 {
      %cst = arith.constant 0.000000e+00 : f32
      %13 = vector.broadcast %cst : f32 to vector<1x2048xf32>
      %c0_10 = arith.constant 0 : index
      %c0_11 = arith.constant 0 : index
      %14 = vector.load %arg5[%c0_10, %c0_11] : memref<1x2048xf32, #tpu.memory_space<vmem>>, vector<1x2048xf32>
      tpu.vector_store %arg5[%c0_10, %c0_11], %13 {strides = array<i32>} : memref<1x2048xf32, #tpu.memory_space<vmem>>, vector<1x2048xf32>,
    } else {
    }
    %c0 = arith.constant 0 : index
    %c0_1 = arith.constant 0 : index
    %3 = vector.load %arg2[%c0, %c0_1] : memref<1x2048xf32, #tpu.memory_space<vmem>>, vector<1x2048xf32>
    %c0_2 = arith.constant 0 : index
    %c0_3 = arith.constant 0 : index
    %4 = vector.load %arg3[%c0_2, %c0_3] : memref<1x2048xf32, #tpu.memory_space<vmem>>, vector<1x2048xf32>
    %5 = arith.subf %3, %4 : vector<1x2048xf32>
    %6 = arith.mulf %5, %5 : vector<1x2048xf32>
    %c0_4 = arith.constant 0 : index
    %c0_5 = arith.constant 0 : index
    %7 = vector.load %arg5[%c0_4, %c0_5] : memref<1x2048xf32, #tpu.memory_space<vmem>>, vector<1x2048xf32>
    %8 = arith.addf %7, %6 : vector<1x2048xf32>
    %c0_6 = arith.constant 0 : index
    %c0_7 = arith.constant 0 : index
    %9 = vector.load %arg5[%c0_6, %c0_7] : memref<1x2048xf32, #tpu.memory_space<vmem>>, vector<1x2048xf32>
    tpu.vector_store %arg5[%c0_6, %c0_7], %8 {strides = array<i32>} : memref<1x2048xf32, #tpu.memory_space<vmem>>, vector<1x2048xf32>,
    %c0_i32_8 = arith.constant 0 : i32
    %10 = arith.cmpi eq, %arg1, %c0_i32_8 : i32
    %11 = arith.extui %10 : i1 to i32
    %c0_i32_9 = arith.constant 0 : i32
    %12 = arith.cmpi ne, %11, %c0_i32_9 : i32
    scf.if %12 {
      %c0_10 = arith.constant 0 : index
      %c0_11 = arith.constant 0 : index
      %13 = vector.load %arg5[%c0_10, %c0_11] : memref<1x2048xf32, #tpu.memory_space<vmem>>, vector<1x2048xf32>
      %14 = vector.shape_cast %13 : vector<1x2048xf32> to vector<1x1x2048xf32>
      %cst = arith.constant dense<0.000000e+00> : vector<1xf32>
      %15 = vector.multi_reduction <add>, %14, %cst [1, 2] : vector<1x1x2048xf32> to vector<1xf32>
      %16 = vector.shape_cast %15 : vector<1xf32> to vector<1x1x1xf32>
      %17 = vector.extract %16[0, 0, 0] : f32 from vector<1x1x1xf32>
      %18 = vector.broadcast %17 : f32 to vector<1x8x128xf32>
      %c0_12 = arith.constant 0 : index
      %c0_13 = arith.constant 0 : index
      %c0_14 = arith.constant 0 : index
      %19 = vector.load %arg4[%c0_12, %c0_13, %c0_14] : memref<1x8x128xf32, #tpu.memory_space<vmem>>, vector<1x8x128xf32>
      tpu.vector_store %arg4[%c0_12, %c0_13, %c0_14], %18 {strides = array<i32>} : memref<1x8x128xf32, #tpu.memory_space<vmem>>, vector<1x8x128xf32>,
    } else {
    }
    return
  }
  func.func @transform_0(%arg0: i32, %arg1: i32) -> (i32, i32) {
    %c1_i32 = arith.constant 1 : i32
    %0 = arith.muli %arg0, %c1_i32 : i32
    %1 = arith.addi %0, %arg1 : i32
    %c0_i32 = arith.constant 0 : i32
    %c0_i32_0 = arith.constant 0 : i32
    return %1, %c0_i32 : i32, i32
  }
  func.func @transform_1(%arg0: i32, %arg1: i32) -> (i32, i32) {
    %c1_i32 = arith.constant 1 : i32
    %0 = arith.muli %arg0, %c1_i32 : i32
    %1 = arith.addi %0, %arg1 : i32
    %c0_i32 = arith.constant 0 : i32
    %c0_i32_0 = arith.constant 0 : i32
    return %1, %c0_i32 : i32, i32
  }
  func.func @transform_2(%arg0: i32, %arg1: i32) -> (i32, i32, i32) {
    %c0_i32 = arith.constant 0 : i32
    %c0_i32_0 = arith.constant 0 : i32
    %c0_i32_1 = arith.constant 0 : i32
    return %arg0, %c0_i32, %c0_i32_0 : i32, i32, i32
  }
}

</mosaic_0001>

<bundles_post_ra>
// kernel: mse_loss_pallas.1
= control target key start
LH: loop header
LB: loop body
LE: loop exit
PB: predicated region body
PF: predicated region fallthrough
CT: control target
= control target key end

     0   :  { %v72_v0 = vlaneseq  ;;  %vm152_vm0 = vcmask 1040384   ;;  %s259_s0 = inlined_call_operand.vmem [shape: f32[1,2048], index: 0, kind: input, shape index: {}]   ;;  %s260_s1 = inlined_call_operand.vmem [shape: f32[1,2048], index: 1, kind: input, shape index: {}]   ;;  %s261_s2 = inlined_call_operand.vmem [shape: f32[1,8,128], index: 2, kind: output, shape index: {}]  }
   0x1   :  { %v51_v1 = vld [vmem:[%s259_s0] sm:$0xff]  ;;  %v52_v10 = vld [vmem:[%s259_s0 + $0x8] sm:$0xff] }
   0x2   :  { %v53_v2 = vld [vmem:[%s260_s1] sm:$0xff]  ;;  %v73_v4 = vshrl.u32 %v72_v0, 7  ;;  %v54_v11 = vld [vmem:[%s260_s1 + $0x8] sm:$0xff] }
   0x3   :  { %v55_v3 = vsub.f32 %v51_v1, %v53_v2  ;;  %v56_v18 = vsub.f32 %v52_v10, %v54_v11 }
   0x4   :  { %v74_v6 = vsub.s32 0, %v73_v4  ;;  %v78_v7 = vsub.s32 1, %v73_v4  ;;  %v82_v8 = vsub.s32 2, %v73_v4  ;;  %v86_v9 = vsub.s32 3, %v73_v4 }
   0x5   :  { %v57_v5 = vmul.f32 %v55_v3, %v55_v3  ;;  %v90_v14 = vsub.s32 4, %v73_v4  ;;  %v94_v17 = vsub.s32 5, %v73_v4  ;;  %v98_v20 = vsub.s32 6, %v73_v4 }
   0x6   :  { %v102_v26 = vsub.s32 7, %v73_v4  ;;  %v58_v29 = vmul.f32 %v56_v18, %v56_v18 }
   0x7   :  { %v75_v12 = vrot.slane %v57_v5, %v74_v6  ;;  %v79_v13 = vrot.slane %v57_v5, %v78_v7  ;;  %v83_v15 = vrot.slane %v57_v5, %v82_v8  ;;  %v87_v16 = vrot.slane %v57_v5, %v86_v9 }
   0x8   :  { %v91_v19 = vrot.slane %v57_v5, %v90_v14  ;;  %v95_v25 = vrot.slane %v57_v5, %v94_v17  ;;  %v99_v30 = vrot.slane %v57_v5, %v98_v20  ;;  %v103_v33 = vrot.slane %v57_v5, %v102_v26 }
   0x9   :  { %v153_v21 = vsel %vm152_vm0, %v75_v12, 0.0  ;;  %v154_v22 = vsel %vm152_vm0, %v79_v13, 0.0  ;;  %v156_v24 = vsel %vm152_vm0, %v83_v15, 0.0  ;;  %v158_v27 = vsel %vm152_vm0, %v87_v16, 0.0 }
   0xa   :  { %v155_v23 = vadd.f32 %v154_v22, %v153_v21  ;;  %v160_v31 = vsel %vm152_vm0, %v91_v19, 0.0  ;;  %v162_v34 = vsel %vm152_vm0, %v95_v25, 0.0  ;;  %v107_v36 = vrot.slane %v58_v29, %v74_v6 }
   0xb   :  { %v164_v37 = vsel %vm152_vm0, %v99_v30, 0.0  ;;  %v111_v39 = vrot.slane %v58_v29, %v78_v7  ;;  %v166_v40 = vsel %vm152_vm0, %v103_v33, 0.0  ;;  %v115_v42 = vrot.slane %v58_v29, %v82_v8 }
   0xc   :  { %v157_v28 = vadd.f32 %v156_v24, %v155_v23  ;;  %v168_v43 = vsel %vm152_vm0, %v107_v36, 0.0  ;;  %v119_v45 = vrot.slane %v58_v29, %v86_v9  ;;  %v123_v48 = vrot.slane %v58_v29, %v90_v14 }
   0xd   :  { %v170_v46 = vsel %vm152_vm0, %v111_v39, 0.0  ;;  %v172_v49 = vsel %vm152_vm0, %v115_v42, 0.0  ;;  %v127_v51 = vrot.slane %v58_v29, %v94_v17  ;;  %v131_v54 = vrot.slane %v58_v29, %v98_v20 }
   0xe   :  { %v159_v32 = vadd.f32 %v158_v27, %v157_v28  ;;  %v174_v52 = vsel %vm152_vm0, %v119_v45, 0.0  ;;  %v176_v55 = vsel %vm152_vm0, %v123_v48, 0.0  ;;  %v135_v57 = vrot.slane %v58_v29, %v102_v26 }
   0xf   :  { %v178_v58 = vsel %vm152_vm0, %v127_v51, 0.0  ;;  %v180_v60 = vsel %vm152_vm0, %v131_v54, 0.0 }
  0x10   :  { %v161_v35 = vadd.f32 %v160_v31, %v159_v32  ;;  %v182_v62 = vsel %vm152_vm0, %v135_v57, 0.0 }
  0x12   :  { %v163_v38 = vadd.f32 %v162_v34, %v161_v35 }
  0x14   :  { %v165_v41 = vadd.f32 %v164_v37, %v163_v38 }
  0x16   :  { %v167_v44 = vadd.f32 %v166_v40, %v165_v41 }
  0x18   :  { %v169_v47 = vadd.f32 %v168_v43, %v167_v44 }
  0x1a   :  { %v171_v50 = vadd.f32 %v170_v46, %v169_v47 }
  0x1c   :  { %v173_v53 = vadd.f32 %v172_v49, %v171_v50 }
  0x1e   :  { %v175_v56 = vadd.f32 %v174_v52, %v173_v53 }
  0x20   :  { %v177_v59 = vadd.f32 %v176_v55, %v175_v56 }
  0x22   :  { %v179_v61 = vadd.f32 %v178_v58, %v177_v59 }
  0x24   :  { %v181_v63 = vadd.f32 %v180_v60, %v179_v61 }
  0x26   :  { %v183_v0 = vadd.f32 %v182_v62, %v181_v63 }
  0x28   :  { %184 = vadd.xlane.f32.xlu0 %v183_v0 }
  0xb1   :  { %v185_v1 = vpop.xlane.xlu0 %184 }
  0xb2   :  { %v186_v2 = vrot.slane %v185_v1, 4 }
  0xb4   :  { %v187_v3 = vadd.f32 %v186_v2, %v185_v1 }
  0xb6   :  { %v188_v4 = vrot.slane %v187_v3, 2 }
  0xb8   :  { %v189_v5 = vadd.f32 %v188_v4, %v187_v3 }
  0xba   :  { %v190_v6 = vrot.slane %v189_v5, 1 }
  0xbc   :  { %v191_v7 = vadd.f32 %v190_v6, %v189_v5 }
  0xbe   :  { %211 = vpush %v191_v7 }
  0xef   :  { %s212_s0 = spop %211 }
  0xf0   :  { %v193_v8 = vstv %s212_s0 }
  0xf1   :  { %194 = vst [vmem:[%s261_s2] sm:$0xff] %v193_v8 }

</bundles_post_ra>
